<compile_context>
chip_gen: v5e
topology: v5e:2x2
jax: 0.10.0
libtpu: 0.0.40
codegen_flags: <defaults>
</compile_context>

<pallas_src>
import functools
import math

import jax
import jax.numpy as jnp
from jax.experimental import pallas as pl
from jax.experimental.pallas import tpu as pltpu

KERNEL_SIZE = 5
PAD = (KERNEL_SIZE - 1) // 2  # padding=True -> 2


def _gaussian_1d(kernel_size: int = KERNEL_SIZE):
    """1-D taps g1 such that outer(g1, g1) equals GaussianFilter's 2-D kernel."""
    mean = (kernel_size - 1) / 2.0
    variance = (kernel_size / 6.0) ** 2.0
    e = [math.exp(-((i - mean) ** 2) / (2.0 * variance)) for i in range(kernel_size)]
    s = sum(e)
    return tuple(v / s for v in e)


# Host-side Python floats, closed over by the kernel (no weights DMA).
G1 = _gaussian_1d()


def _gauss_sep_kernel(x_ref, o_ref, pad_ref, tmp_ref, *, H, W, g1):
    """Separable 'same' 5x5 Gaussian over a (Bn, H, W) block.

    x_ref  : (Bn, H, W)       input block (VMEM)
    o_ref  : (Bn, H, W)       output block (VMEM)
    pad_ref: (Bn, H+4, W+4)   zero-halo scratch (VMEM)
    tmp_ref: (Bn, H,   W+4)   vertical-pass scratch (VMEM)
    """
    ks = len(g1)

    # Build the zero-padded image inside VMEM (no HBM pad pass in the wrapper).
    pad_ref[...] = jnp.zeros_like(pad_ref)
    pad_ref[:, PAD:PAD + H, PAD:PAD + W] = x_ref[...].astype(jnp.float32)

    # Vertical pass: 5 cheap sublane-offset slices of the padded scratch.
    acc = g1[0] * pad_ref[:, 0:H, :]
    for ki in range(1, ks):
        acc = acc + g1[ki] * pad_ref[:, ki:ki + H, :]
    tmp_ref[...] = acc

    # Horizontal pass: 5 lane-offset slices of the intermediate scratch.
    out = g1[0] * tmp_ref[:, :, 0:W]
    for kj in range(1, ks):
        out = out + g1[kj] * tmp_ref[:, :, kj:kj + W]
    o_ref[...] = out.astype(o_ref.dtype)


def _pick_batch_block(N, H, W, budget_bytes=8 << 20):
    """Largest divisor of N (capped) whose VMEM footprint fits the budget."""
    Hp, Wp = H + 2 * PAD, W + 2 * PAD
    # double-buffered input + output blocks, plus the two scratch buffers (f32)
    per_img = 4 * (2 * H * W + 2 * H * W + Hp * Wp + H * Wp)
    cap = max(1, budget_bytes // per_img)
    cap = int(min(cap, 32, N))
    for b in range(cap, 0, -1):
        if N % b == 0:
            return b
    return 1


def gaussian_filter_pallas(x_nhw: jnp.ndarray) -> jnp.ndarray:
    """x_nhw: (N, H, W) float32 -> (N, H, W) float32 ('same' 5x5 Gaussian conv)."""
    N, H, W = x_nhw.shape
    Hp, Wp = H + 2 * PAD, W + 2 * PAD
    Bn = _pick_batch_block(N, H, W)
    # TODO(synk): for very large frames (e.g. 4K on v7x's 64 MiB VMEM), add
    # H-tiling with a 4-row halo and a second 'parallel' grid axis.

    kernel = functools.partial(_gauss_sep_kernel, H=H, W=W, g1=G1)
    return pl.pallas_call(
        kernel,
        out_shape=jax.ShapeDtypeStruct((N, H, W), jnp.float32),
        grid_spec=pltpu.PrefetchScalarGridSpec(
            num_scalar_prefetch=0,
            grid=(N // Bn,),
            in_specs=[
                # last two dims equal the full array dims -> allowed block shape
                pl.BlockSpec((Bn, H, W), lambda n: (n, 0, 0)),
            ],
            out_specs=pl.BlockSpec((Bn, H, W), lambda n: (n, 0, 0)),
            scratch_shapes=[
                pltpu.VMEM((Bn, Hp, Wp), jnp.float32),  # zero-halo padded image
                pltpu.VMEM((Bn, H, Wp), jnp.float32),   # vertical-pass result
            ],
        ),
        compiler_params=pltpu.CompilerParams(
            dimension_semantics=("parallel",),
        ),
    )(x_nhw)


def filter_low_forward(img: jnp.ndarray, recursions: int = 1) -> jnp.ndarray:
    """FilterLow.forward: img is NCHW with C=1, returns float32 NCHW."""
    N, C, H, W = img.shape
    assert C == 1, "GaussianFilter is Conv2d(1, 1, ...): expects a single channel"
    x = img[:, 0, :, :].astype(jnp.float32)  # (N, H, W)
    for _ in range(recursions):
        x = gaussian_filter_pallas(x)
    return x[:, None, :, :].astype(jnp.float32)  # matches .type(torch.float32)


def _reference(img: jnp.ndarray, recursions: int = 1) -> jnp.ndarray:
    """Pure-JAX reference (direct 25-tap 'same' conv) for validation."""
    g1 = jnp.asarray(G1, dtype=jnp.float32)
    g2 = jnp.outer(g1, g1)
    x = img[:, 0, :, :].astype(jnp.float32)
    N, H, W = x.shape
    for _ in range(recursions):
        xp = jnp.pad(x, ((0, 0), (PAD, PAD), (PAD, PAD)))
        out = jnp.zeros_like(x)
        for i in range(KERNEL_SIZE):
            for j in range(KERNEL_SIZE):
                out = out + g2[i, j] * xp[:, i:i + H, j:j + W]
        x = out
    return x[:, None, :, :].astype(jnp.float32)


if __name__ == "__main__":
    key = jax.random.PRNGKey(0)
    img = jax.random.normal(key, (2, 1, 16, 16), dtype=jnp.float32)

    out = filter_low_forward(img, recursions=1)
    out = jax.block_until_ready(out)

    assert out.shape == (2, 1, 16, 16)
    assert out.dtype == jnp.float32

    ref = jax.block_until_ready(_reference(img, recursions=1))
    assert jnp.allclose(out, ref, atol=1e-5, rtol=1e-5), "mismatch vs. reference"

    print("KERNEL_OK")
</pallas_src>

<mosaic_0001>
module attributes {stable_mosaic.version = 11 : i64} {
  func.func @_gauss_sep_kernel(%arg0: i32, %arg1: memref<2x16x16xf32, #tpu.memory_space<vmem>>, %arg2: memref<2x16x16xf32, #tpu.memory_space<vmem>>, %arg3: memref<2x20x20xf32, #tpu.memory_space<vmem>>, %arg4: memref<2x16x20xf32, #tpu.memory_space<vmem>>) attributes {dimension_semantics = [#tpu.dimension_semantics<parallel>], iteration_bounds = array<i64: 1>, scalar_prefetch = 0 : i64, scratch_operands = 2 : i64, tpu.core_type = #tpu.core_type<tc>, window_params = [{transform_indices = @transform_0, window_bounds = array<i64: 2, 16, 16>}, {transform_indices = @transform_1, window_bounds = array<i64: 2, 16, 16>}]} {
    %cst = arith.constant 0.000000e+00 : f32
    %0 = vector.broadcast %cst : f32 to vector<2x20x20xf32>
    %c0 = arith.constant 0 : index
    %c0_0 = arith.constant 0 : index
    %c0_1 = arith.constant 0 : index
    %1 = vector.load %arg3[%c0, %c0_0, %c0_1] : memref<2x20x20xf32, #tpu.memory_space<vmem>>, vector<2x20x20xf32>
    tpu.vector_store %arg3[%c0, %c0_0, %c0_1], %0 {strides = array<i32>} : memref<2x20x20xf32, #tpu.memory_space<vmem>>, vector<2x20x20xf32>,
    %c0_2 = arith.constant 0 : index
    %c0_3 = arith.constant 0 : index
    %c0_4 = arith.constant 0 : index
    %2 = vector.load %arg1[%c0_2, %c0_3, %c0_4] : memref<2x16x16xf32, #tpu.memory_space<vmem>>, vector<2x16x16xf32>
    %c0_5 = arith.constant 0 : index
    %c2 = arith.constant 2 : index
    %c2_6 = arith.constant 2 : index
    %3 = vector.load %arg3[%c0_5, %c2, %c2_6] : memref<2x20x20xf32, #tpu.memory_space<vmem>>, vector<2x16x16xf32>
    tpu.vector_store %arg3[%c0_5, %c2, %c2_6], %2 {strides = array<i32>} : memref<2x20x20xf32, #tpu.memory_space<vmem>>, vector<2x16x16xf32>,
    %c0_7 = arith.constant 0 : index
    %c0_8 = arith.constant 0 : index
    %c0_9 = arith.constant 0 : index
    %4 = vector.load %arg3[%c0_7, %c0_8, %c0_9] : memref<2x20x20xf32, #tpu.memory_space<vmem>>, vector<2x16x20xf32>
    %cst_10 = arith.constant 0.0269131567 : f32
    %5 = vector.broadcast %cst_10 : f32 to vector<2x16x20xf32>
    %6 = arith.mulf %5, %4 : vector<2x16x20xf32>
    %c0_11 = arith.constant 0 : index
    %c1 = arith.constant 1 : index
    %c0_12 = arith.constant 0 : index
    %7 = vector.load %arg3[%c0_11, %c1, %c0_12] : memref<2x20x20xf32, #tpu.memory_space<vmem>>, vector<2x16x20xf32>
    %cst_13 = arith.constant 0.233367682 : f32
    %8 = vector.broadcast %cst_13 : f32 to vector<2x16x20xf32>
    %9 = arith.mulf %8, %7 : vector<2x16x20xf32>
    %10 = arith.addf %6, %9 : vector<2x16x20xf32>
    %c0_14 = arith.constant 0 : index
    %c2_15 = arith.constant 2 : index
    %c0_16 = arith.constant 0 : index
    %11 = vector.load %arg3[%c0_14, %c2_15, %c0_16] : memref<2x20x20xf32, #tpu.memory_space<vmem>>, vector<2x16x20xf32>
    %cst_17 = arith.constant 0.479438305 : f32
    %12 = vector.broadcast %cst_17 : f32 to vector<2x16x20xf32>
    %13 = arith.mulf %12, %11 : vector<2x16x20xf32>
    %14 = arith.addf %10, %13 : vector<2x16x20xf32>
    %c0_18 = arith.constant 0 : index
    %c3 = arith.constant 3 : index
    %c0_19 = arith.constant 0 : index
    %15 = vector.load %arg3[%c0_18, %c3, %c0_19] : memref<2x20x20xf32, #tpu.memory_space<vmem>>, vector<2x16x20xf32>
    %cst_20 = arith.constant 0.233367682 : f32
    %16 = vector.broadcast %cst_20 : f32 to vector<2x16x20xf32>
    %17 = arith.mulf %16, %15 : vector<2x16x20xf32>
    %18 = arith.addf %14, %17 : vector<2x16x20xf32>
    %c0_21 = arith.constant 0 : index
    %c4 = arith.constant 4 : index
    %c0_22 = arith.constant 0 : index
    %19 = vector.load %arg3[%c0_21, %c4, %c0_22] : memref<2x20x20xf32, #tpu.memory_space<vmem>>, vector<2x16x20xf32>
    %cst_23 = arith.constant 0.0269131567 : f32
    %20 = vector.broadcast %cst_23 : f32 to vector<2x16x20xf32>
    %21 = arith.mulf %20, %19 : vector<2x16x20xf32>
    %22 = arith.addf %18, %21 : vector<2x16x20xf32>
    %c0_24 = arith.constant 0 : index
    %c0_25 = arith.constant 0 : index
    %c0_26 = arith.constant 0 : index
    %23 = vector.load %arg4[%c0_24, %c0_25, %c0_26] : memref<2x16x20xf32, #tpu.memory_space<vmem>>, vector<2x16x20xf32>
    tpu.vector_store %arg4[%c0_24, %c0_25, %c0_26], %22 {strides = array<i32>} : memref<2x16x20xf32, #tpu.memory_space<vmem>>, vector<2x16x20xf32>,
    %c0_27 = arith.constant 0 : index
    %c0_28 = arith.constant 0 : index
    %c0_29 = arith.constant 0 : index
    %24 = vector.load %arg4[%c0_27, %c0_28, %c0_29] : memref<2x16x20xf32, #tpu.memory_space<vmem>>, vector<2x16x16xf32>
    %cst_30 = arith.constant 0.0269131567 : f32
    %25 = vector.broadcast %cst_30 : f32 to vector<2x16x16xf32>
    %26 = arith.mulf %25, %24 : vector<2x16x16xf32>
    %c0_31 = arith.constant 0 : index
    %c0_32 = arith.constant 0 : index
    %c1_33 = arith.constant 1 : index
    %27 = vector.load %arg4[%c0_31, %c0_32, %c1_33] : memref<2x16x20xf32, #tpu.memory_space<vmem>>, vector<2x16x16xf32>
    %cst_34 = arith.constant 0.233367682 : f32
    %28 = vector.broadcast %cst_34 : f32 to vector<2x16x16xf32>
    %29 = arith.mulf %28, %27 : vector<2x16x16xf32>
    %30 = arith.addf %26, %29 : vector<2x16x16xf32>
    %c0_35 = arith.constant 0 : index
    %c0_36 = arith.constant 0 : index
    %c2_37 = arith.constant 2 : index
    %31 = vector.load %arg4[%c0_35, %c0_36, %c2_37] : memref<2x16x20xf32, #tpu.memory_space<vmem>>, vector<2x16x16xf32>
    %cst_38 = arith.constant 0.479438305 : f32
    %32 = vector.broadcast %cst_38 : f32 to vector<2x16x16xf32>
    %33 = arith.mulf %32, %31 : vector<2x16x16xf32>
    %34 = arith.addf %30, %33 : vector<2x16x16xf32>
    %c0_39 = arith.constant 0 : index
    %c0_40 = arith.constant 0 : index
    %c3_41 = arith.constant 3 : index
    %35 = vector.load %arg4[%c0_39, %c0_40, %c3_41] : memref<2x16x20xf32, #tpu.memory_space<vmem>>, vector<2x16x16xf32>
    %cst_42 = arith.constant 0.233367682 : f32
    %36 = vector.broadcast %cst_42 : f32 to vector<2x16x16xf32>
    %37 = arith.mulf %36, %35 : vector<2x16x16xf32>
    %38 = arith.addf %34, %37 : vector<2x16x16xf32>
    %c0_43 = arith.constant 0 : index
    %c0_44 = arith.constant 0 : index
    %c4_45 = arith.constant 4 : index
    %39 = vector.load %arg4[%c0_43, %c0_44, %c4_45] : memref<2x16x20xf32, #tpu.memory_space<vmem>>, vector<2x16x16xf32>
    %cst_46 = arith.constant 0.0269131567 : f32
    %40 = vector.broadcast %cst_46 : f32 to vector<2x16x16xf32>
    %41 = arith.mulf %40, %39 : vector<2x16x16xf32>
    %42 = arith.addf %38, %41 : vector<2x16x16xf32>
    %c0_47 = arith.constant 0 : index
    %c0_48 = arith.constant 0 : index
    %c0_49 = arith.constant 0 : index
    %43 = vector.load %arg2[%c0_47, %c0_48, %c0_49] : memref<2x16x16xf32, #tpu.memory_space<vmem>>, vector<2x16x16xf32>
    tpu.vector_store %arg2[%c0_47, %c0_48, %c0_49], %42 {strides = array<i32>} : memref<2x16x16xf32, #tpu.memory_space<vmem>>, vector<2x16x16xf32>,
    return
  }
  func.func @transform_0(%arg0: i32) -> (i32, i32, i32) {
    %c0_i32 = arith.constant 0 : i32
    %c0_i32_0 = arith.constant 0 : i32
    %c0_i32_1 = arith.constant 0 : i32
    return %arg0, %c0_i32, %c0_i32_0 : i32, i32, i32
  }
  func.func @transform_1(%arg0: i32) -> (i32, i32, i32) {
    %c0_i32 = arith.constant 0 : i32
    %c0_i32_0 = arith.constant 0 : i32
    %c0_i32_1 = arith.constant 0 : i32
    return %arg0, %c0_i32, %c0_i32_0 : i32, i32, i32
  }
}

</mosaic_0001>

<bundles_post_ra>
// kernel: tpu_custom_call.1
= control target key start
LH: loop header
LB: loop body
LE: loop exit
PB: predicated region body
PF: predicated region fallthrough
CT: control target
= control target key end

     0   :  { %6 = vsyncpa [#allocation5], 0  ;;  %s340_s0 = inlined_call_operand.hbm [shape: f32[2,16,16], index: 0, kind: input, shape index: {}]   ;;  %s341_s1 = inlined_call_operand.hbm [shape: f32[2,16,16], index: 1, kind: output, shape index: {}]  }
   0x1   :  { %7 = vsyncpa [#allocation6], 0  ;;  %s12_s8 = sshll.u32 %s340_s0, 4  ;;  %s296_s9 = smov [#allocation4]   ;;  %s13_s8 = int_to_ptr.hbm [resolvable:$true] %s12_s8 }
   0x2   :  { %s14_s10 = sshll.u32 %s296_s9, 4  ;;  %s297_s11 = smov 128   ;;  %s15_s10 = int_to_ptr.vmem [resolvable:$true] %s14_s10 }
   0x3   :  { %s298_s12 = smov 8  }
   0x4   :  { %20 = dma.hbm_to_vmem [thread:$0]  %s13_s8, 512, %s15_s10, [#allocation5], %s297_s11, %s297_s11, %s298_s12  }
   0x5   :  { %292 = dma.done.wait [#allocation5], 512  }
   0x6   :  { %293 = vsyncadd [#allocation5], 4294966784  ;;  %vm25_vm0 = vcmask 162816   ;;  %v299_v0 = vmov 0.0   ;;  %v35_v1 = vld [vmem:[#allocation4 + $0x10] sm:$0xff]  ;;  %v33_v2 = vld [vmem:[#allocation4] sm:$0xff] }
   0x7   :  { %30 = vst.msk [vmem:[#allocation2 + $0x18] sm:$0xff] %vm25_vm0, %v299_v0  ;;  %s300_s0 = smov 2   ;;  %v36_v3 = vld [vmem:[#allocation4 + $0x18] sm:$0xff]  ;;  %v34_v4 = vld [vmem:[#allocation4 + $0x8] sm:$0xff]  ;;  %vm28_vm1 = vcmask 158720   ;;  %vm53_vm2 = vcmask 146448  }
   0x8   :  { %31 = vst.msk [vmem:[#allocation2 + $0x20] sm:$0xff] %vm25_vm0, %v299_v0  ;;  %45 = vrot.lane.b32.xlu1 %v35_v1, %s300_s0  ;;  %41 = vrot.lane.b32.xlu0 %v33_v2, %s300_s0  ;;  %s301_s13 = smov 127   ;;  %s302_s14 = smov 126   ;;  %vm210_vm3 = vcmask 130048  }
   0x9   :  { %26 = vst.msk [vmem:[#allocation2] sm:$0xff] %vm25_vm0, %v299_v0  ;;  %s303_s15 = smov 125   ;;  %s304_s16 = smov 124  }
   0xa   :  { %27 = vst.msk [vmem:[#allocation2 + $0x8] sm:$0xff] %vm25_vm0, %v299_v0  ;;  %s305_s17 = smov [#allocation7]   ;;  %s221_s21 = sshll.u32 %s341_s1, 4  ;;  %s222_s21 = int_to_ptr.hbm [resolvable:$true] %s221_s21 }
   0xb   :  { %32 = vst.msk [vmem:[#allocation2 + $0x28] sm:$0xf] %vm28_vm1, %v299_v0  ;;  %s219_s18 = sshll.u32 %s305_s17, 4  ;;  %s220_s18 = int_to_ptr.vmem [resolvable:$true] %s219_s18 }
   0xc   :  { %29 = vst.msk [vmem:[#allocation2 + $0x10] sm:$0xf] %vm28_vm1, %v299_v0 }
  0x10   :  { %47 = vrot.lane.b32.xlu1 %v36_v3, %s300_s0  ;;  %43 = vrot.lane.b32.xlu0 %v34_v4, %s300_s0 }
  0x7a   :  { %v46_v5 = vpop.permute.xlu1 %45  ;;  %v42_v6 = vpop.permute.xlu0 %41 }
  0x7b   :  { %56 = vst.msk [vmem:[#allocation2 + $0x1a] sm:$0xff] %vm53_vm2, %v46_v5 }
  0x7c   :  { %54 = vst.msk [vmem:[#allocation2 + $0x2] sm:$0xff] %vm53_vm2, %v42_v6 }
  0x82   :  { %v48_v7 = vpop.permute.xlu1 %47  ;;  %v60_v8 = vld [vmem:[#allocation2 + $0x18] sm:$0xff]  ;;  %v44_v10 = vpop.permute.xlu0 %43 }
  0x83   :  { %v68_v9 = vld [vmem:[#allocation2 + $0x19] sm:$0xff]  ;;  %57 = vst.msk [vmem:[#allocation2 + $0x22] sm:$0xff] %vm53_vm2, %v48_v7  ;;  %v66_v12 = vld [vmem:[#allocation2 + $0x1] sm:$0xff]  ;;  %v64_v13 = vmul.f32 0.026913157, %v60_v8 }
  0x84   :  { %v58_v11 = vld [vmem:[#allocation2] sm:$0xff]  ;;  %v72_v14 = vmul.f32 0.23336768, %v68_v9  ;;  %55 = vst.msk [vmem:[#allocation2 + $0xa] sm:$0xff] %vm53_vm2, %v44_v10  ;;  %v70_v17 = vmul.f32 0.23336768, %v66_v12 }
  0x85   :  { %v80_v15 = vld [vmem:[#allocation2 + $0x1a] sm:$0xff]  ;;  %v62_v16 = vmul.f32 0.026913157, %v58_v11  ;;  %v78_v18 = vld [vmem:[#allocation2 + $0x2] sm:$0xff] }
  0x86   :  { %v76_v19 = vadd.f32 %v72_v14, %v64_v13  ;;  %v84_v20 = vmul.f32 0.4794383, %v80_v15  ;;  %v82_v25 = vmul.f32 0.4794383, %v78_v18 }
  0x87   :  { %v74_v24 = vadd.f32 %v70_v17, %v62_v16 }
  0x88   :  { %v88_v31 = vadd.f32 %v84_v20, %v76_v19 }
  0x89   :  { %v86_v39 = vadd.f32 %v82_v25, %v74_v24 }
  0x8a   :  { %v61_v21 = vld [vmem:[#allocation2 + $0x20] sm:$0xff] }
  0x8b   :  { %v69_v22 = vld [vmem:[#allocation2 + $0x21] sm:$0xff]  ;;  %v65_v26 = vmul.f32 0.026913157, %v61_v21  ;;  %v67_v43 = vld [vmem:[#allocation2 + $0x9] sm:$0xff] }
  0x8c   :  { %v81_v23 = vld [vmem:[#allocation2 + $0x22] sm:$0xff]  ;;  %v73_v27 = vmul.f32 0.23336768, %v69_v22  ;;  %v79_v44 = vld [vmem:[#allocation2 + $0xa] sm:$0xff]  ;;  %v71_v46 = vmul.f32 0.23336768, %v67_v43 }
  0x8d   :  { %v92_v28 = vld [vmem:[#allocation2 + $0x1b] sm:$0xff]  ;;  %v93_v29 = vld [vmem:[#allocation2 + $0x23] sm:$0xff]  ;;  %v85_v33 = vmul.f32 0.4794383, %v81_v23  ;;  %v83_v47 = vmul.f32 0.4794383, %v79_v44 }
  0x8e   :  { %v104_v30 = vld [vmem:[#allocation2 + $0x1c] sm:$0xff]  ;;  %v77_v32 = vadd.f32 %v73_v27, %v65_v26  ;;  %v96_v34 = vmul.f32 0.23336768, %v92_v28  ;;  %v59_v35 = vld [vmem:[#allocation2 + $0x8] sm:$0xff]  ;;  %v97_v36 = vmul.f32 0.23336768, %v93_v29 }
  0x8f   :  { %v105_v37 = vld [vmem:[#allocation2 + $0x24] sm:$0xff]  ;;  %v63_v38 = vmul.f32 0.026913157, %v59_v35  ;;  %v108_v42 = vmul.f32 0.026913157, %v104_v30  ;;  %v103_v54 = vld [vmem:[#allocation2 + $0xc] sm:$0xff] }
  0x90   :  { %v89_v40 = vadd.f32 %v85_v33, %v77_v32  ;;  %v100_v41 = vadd.f32 %v96_v34, %v88_v31  ;;  %v90_v45 = vld [vmem:[#allocation2 + $0x3] sm:$0xff]  ;;  %v91_v48 = vld [vmem:[#allocation2 + $0xb] sm:$0xff]  ;;  %v109_v51 = vmul.f32 0.026913157, %v105_v37  ;;  %v107_v61 = vmul.f32 0.026913157, %v103_v54 }
  0x91   :  { %v102_v49 = vld [vmem:[#allocation2 + $0x4] sm:$0xff]  ;;  %v94_v53 = vmul.f32 0.23336768, %v90_v45  ;;  %v75_v55 = vadd.f32 %v71_v46, %v63_v38  ;;  %v95_v56 = vmul.f32 0.23336768, %v91_v48 }
  0x92   :  { %v101_v50 = vadd.f32 %v97_v36, %v89_v40  ;;  %v112_v52 = vadd.f32 %v108_v42, %v100_v41  ;;  %v106_v59 = vmul.f32 0.026913157, %v102_v49 }
  0x93   :  { %v98_v58 = vadd.f32 %v94_v53, %v86_v39  ;;  %v87_v60 = vadd.f32 %v83_v47, %v75_v55 }
  0x94   :  { %v113_v57 = vadd.f32 %v109_v51, %v101_v50  ;;  %116 = vst.msk [vmem:[#allocation3 + $0x10] sm:$0xff] %vm25_vm0, %v112_v52 }
  0x95   :  { %v110_v62 = vadd.f32 %v106_v59, %v98_v58  ;;  %v99_v63 = vadd.f32 %v95_v56, %v87_v60 }
  0x96   :  { %117 = vst.msk [vmem:[#allocation3 + $0x18] sm:$0xff] %vm25_vm0, %v113_v57 }
  0x97   :  { %114 = vst.msk [vmem:[#allocation3] sm:$0xff] %vm25_vm0, %v110_v62  ;;  %v111_v0 = vadd.f32 %v107_v61, %v99_v63 }
  0x99   :  { %115 = vst.msk [vmem:[#allocation3 + $0x8] sm:$0xff] %vm25_vm0, %v111_v0 }
  0x9b   :  { %v120_v1 = vld [vmem:[#allocation3 + $0x10] sm:$0xff] }
  0x9c   :  { %v128_v2 = vmul.f32 0.23336768, %v120_v1  ;;  %v152_v9 = vmul.f32 0.4794383, %v120_v1  ;;  %v124_v14 = vmul.f32 0.026913157, %v120_v1 }
  0x9d   :  { %v121_v3 = vld [vmem:[#allocation3 + $0x18] sm:$0xff] }
  0x9e   :  { %138 = vrot.lane.b32.xlu0 %v128_v2, %s301_s13  ;;  %v129_v4 = vmul.f32 0.23336768, %v121_v3  ;;  %v118_v5 = vld [vmem:[#allocation3] sm:$0xff]  ;;  %v153_v13 = vmul.f32 0.4794383, %v121_v3 }
  0x9f   :  { %v126_v6 = vmul.f32 0.23336768, %v118_v5  ;;  %v150_v11 = vmul.f32 0.4794383, %v118_v5  ;;  %v122_v12 = vmul.f32 0.026913157, %v118_v5 }
  0xa0   :  { %140 = vrot.lane.b32.xlu1 %v129_v4, %s301_s13  ;;  %v119_v7 = vld [vmem:[#allocation3 + $0x8] sm:$0xff]  ;;  %v125_v15 = vmul.f32 0.026913157, %v121_v3 }
  0xa1   :  { %134 = vrot.lane.b32.xlu2 %v126_v6, %s301_s13  ;;  %v151_v8 = vmul.f32 0.4794383, %v119_v7  ;;  %v127_v10 = vmul.f32 0.23336768, %v119_v7  ;;  %v123_v16 = vmul.f32 0.026913157, %v119_v7 }
  0xa6   :  { %160 = vrot.lane.b32.xlu0 %v151_v8, %s302_s14 }
  0xa8   :  { %162 = vrot.lane.b32.xlu1 %v152_v9, %s302_s14 }
  0xa9   :  { %136 = vrot.lane.b32.xlu2 %v127_v10, %s301_s13 }
  0xae   :  { %174 = vrot.lane.b32.xlu0 %v126_v6, %s303_s15 }
  0xb0   :  { %176 = vrot.lane.b32.xlu1 %v127_v10, %s303_s15 }
  0xb1   :  { %158 = vrot.lane.b32.xlu2 %v150_v11, %s302_s14 }
  0xb6   :  { %180 = vrot.lane.b32.xlu0 %v129_v4, %s303_s15 }
  0xb8   :  { %194 = vrot.lane.b32.xlu1 %v122_v12, %s304_s16 }
  0xb9   :  { %164 = vrot.lane.b32.xlu2 %v153_v13, %s302_s14 }
  0xbe   :  { %198 = vrot.lane.b32.xlu0 %v124_v14, %s304_s16 }
  0xc0   :  { %200 = vrot.lane.b32.xlu1 %v125_v15, %s304_s16 }
  0xc1   :  { %178 = vrot.lane.b32.xlu2 %v128_v2, %s303_s15 }
  0xc9   :  { %196 = vrot.lane.b32.xlu2 %v123_v16, %s304_s16 }
  0xfb   :  { %v135_v17 = vpop.permute.xlu2 %134 }
  0xfc   :  { %v146_v32 = vadd.f32 %v135_v17, %v122_v12 }
 0x103   :  { %v137_v18 = vpop.permute.xlu2 %136 }
 0x104   :  { %v147_v26 = vadd.f32 %v137_v18, %v123_v16 }
 0x10b   :  { %v159_v19 = vpop.permute.xlu2 %158 }
 0x10c   :  { %v170_v34 = vadd.f32 %v159_v19, %v146_v32 }
 0x110   :  { %v139_v20 = vpop.permute.xlu0 %138 }
 0x111   :  { %v148_v36 = vadd.f32 %v139_v20, %v124_v14 }
 0x112   :  { %v141_v21 = vpop.permute.xlu1 %140 }
 0x113   :  { %v165_v22 = vpop.permute.xlu2 %164  ;;  %v149_v39 = vadd.f32 %v141_v21, %v125_v15 }
 0x115   :  { %v173_v42 = vadd.f32 %v165_v22, %v149_v39 }
 0x118   :  { %v161_v23 = vpop.permute.xlu0 %160 }
 0x119   :  { %v171_v28 = vadd.f32 %v161_v23, %v147_v26 }
 0x11a   :  { %v163_v24 = vpop.permute.xlu1 %162 }
 0x11b   :  { %v179_v25 = vpop.permute.xlu2 %178  ;;  %v172_v40 = vadd.f32 %v163_v24, %v148_v36 }
 0x11d   :  { %v188_v43 = vadd.f32 %v179_v25, %v172_v40 }
 0x120   :  { %v175_v27 = vpop.permute.xlu0 %174 }
 0x121   :  { %v186_v37 = vadd.f32 %v175_v27, %v170_v34 }
 0x122   :  { %v177_v29 = vpop.permute.xlu1 %176 }
 0x123   :  { %v187_v30 = vadd.f32 %v177_v29, %v171_v28  ;;  %v197_v31 = vpop.permute.xlu2 %196 }
 0x125   :  { %v207_v33 = vadd.f32 %v197_v31, %v187_v30 }
 0x127   :  { %212 = vst.msk [vmem:[#allocation7 + $0x8] sm:$0xff] %vm210_vm3, %v207_v33 }
 0x128   :  { %v181_v35 = vpop.permute.xlu0 %180 }
 0x129   :  { %v189_v45 = vadd.f32 %v181_v35, %v173_v42 }
 0x12a   :  { %v195_v38 = vpop.permute.xlu1 %194 }
 0x12b   :  { %v206_v41 = vadd.f32 %v195_v38, %v186_v37 }
 0x12d   :  { %211 = vst.msk [vmem:[#allocation7] sm:$0xff] %vm210_vm3, %v206_v41 }
 0x130   :  { %v199_v44 = vpop.permute.xlu0 %198 }
 0x131   :  { %v208_v46 = vadd.f32 %v199_v44, %v188_v43 }
 0x132   :  { %v201_v47 = vpop.permute.xlu1 %200 }
 0x133   :  { %213 = vst.msk [vmem:[#allocation7 + $0x10] sm:$0xff] %vm210_vm3, %v208_v46  ;;  %v209_v48 = vadd.f32 %v201_v47, %v189_v45 }
 0x135   :  { %214 = vst.msk [vmem:[#allocation7 + $0x18] sm:$0xff] %vm210_vm3, %v209_v48 }
 0x136   :  { %227 = dma.vmem_to_hbm [thread:$0]  %s220_s18, 512, %s222_s21, [#allocation6], %s297_s11, %s297_s11, %s298_s12  }
 0x137   :  { %294 = dma.done.wait [#allocation6], 512  }
 0x138   :  { %295 = vsyncadd [#allocation6], 4294966784 }
 0x139   :  { %232 = vsyncpa [#allocation5], 1 }
 0x13a   :  { %233 = vsyncpa [#allocation6], 1 }

</bundles_post_ra>
